<compile_context>
chip_gen: v6e
topology: v6e:2x2x1
jax: 0.10.0
libtpu: 0.0.40
codegen_flags: <defaults>
</compile_context>

<pallas_src>
import functools

import jax
import jax.numpy as jnp
from jax.experimental import pallas as pl
from jax.experimental.pallas import tpu as pltpu


def _round_up(x, m):
    return (x + m - 1) // m * m


# ---------------------------------------------------------------------------
# Kernel 1: row-tiled Linear  (y = x @ W + b), f32 MXU matmul
# ---------------------------------------------------------------------------
def _linear_kernel(x_ref, w_ref, b_ref, o_ref):
    acc = jnp.dot(
        x_ref[...].astype(jnp.float32),
        w_ref[...].astype(jnp.float32),
        preferred_element_type=jnp.float32,
    ) + b_ref[...]
    o_ref[...] = acc.astype(o_ref.dtype)


def pallas_linear(x, w, b, out_dtype=jnp.float32, tm_cap=128):
    n, fin = x.shape
    fout = w.shape[1]
    tm = min(tm_cap, _round_up(n, 32))
    n_pad = _round_up(n, tm)
    if n_pad != n:
        x = jnp.pad(x, ((0, n_pad - n), (0, 0)))
    out = pl.pallas_call(
        _linear_kernel,
        out_shape=jax.ShapeDtypeStruct((n_pad, fout), out_dtype),
        grid=(n_pad // tm,),
        in_specs=[
            pl.BlockSpec((tm, fin), lambda i: (i, 0)),
            pl.BlockSpec((fin, fout), lambda i: (0, 0)),
            pl.BlockSpec((1, fout), lambda i: (0, 0)),
        ],
        out_specs=pl.BlockSpec((tm, fout), lambda i: (i, 0)),
        compiler_params=pltpu.CompilerParams(
            dimension_semantics=("parallel",)),
    )(x, w, b.reshape(1, fout))
    return out[:n]


# ---------------------------------------------------------------------------
# Kernel 2: per-edge-type HAN node-level attention (dense masked form),
#           tiled over dst nodes, lane-dense [N, hidden] layout.
# ---------------------------------------------------------------------------
def _han_edge_kernel(xs_ref, xd_ref, asrc_ref, adst_ref, adj_ref, o_ref, *, heads):
    hidden = xs_ref.shape[1]
    d = hidden // heads
    neg = jnp.float32(-1e30)

    xs = xs_ref[...].astype(jnp.float32)                     # [Ns, hidden]
    xd = xd_ref[...].astype(jnp.float32)                     # [tNd, hidden]

    # per-head attention logits on the MXU (block-diagonal packed lin_src/lin_dst)
    a_src = jnp.dot(xs, asrc_ref[...], preferred_element_type=jnp.float32)  # [Ns, H]
    a_dst = jnp.dot(xd, adst_ref[...], preferred_element_type=jnp.float32)  # [tNd, H]
    a_src_t = a_src.T                                        # [H, Ns]

    adj_mask = adj_ref[...] > 0                              # [tNd, Ns] bool

    parts = []
    for h in range(heads):
        s = a_dst[:, h:h + 1] + a_src_t[h:h + 1, :]          # [tNd, Ns]
        s = jnp.maximum(s, 0.2 * s)                          # leaky_relu(0.2)
        s = jnp.where(adj_mask, s, neg)
        m = jnp.max(s, axis=-1, keepdims=True)               # [tNd, 1]
        m = jnp.where(m > 0.5 * neg, m, 0.0)                 # isolated dst rows
        p = jnp.exp(s - m)                                   # masked -> underflow to 0
        denom = jnp.sum(p, axis=-1, keepdims=True)
        inv = 1.0 / jnp.where(denom > 0.0, denom, 1.0)
        agg = jnp.dot(p, xs[:, h * d:(h + 1) * d],
                      preferred_element_type=jnp.float32)    # [tNd, D]
        parts.append(jnp.maximum(agg * inv, 0.0))            # F.relu
    o_ref[...] = jnp.concatenate(parts, axis=-1)             # one lane-dense store


def pallas_han_edge(xs, xd, a_src_pack, a_dst_pack, adj, heads):
    ns, hidden = xs.shape
    nd = xd.shape[0]
    tnd = min(128, _round_up(nd, 32))
    nd_pad = _round_up(nd, tnd)
    if nd_pad != nd:
        xd = jnp.pad(xd, ((0, nd_pad - nd), (0, 0)))
        adj = jnp.pad(adj, ((0, nd_pad - nd), (0, 0)))
    out = pl.pallas_call(
        functools.partial(_han_edge_kernel, heads=heads),
        out_shape=jax.ShapeDtypeStruct((nd_pad, hidden), jnp.float32),
        grid=(nd_pad // tnd,),
        in_specs=[
            pl.BlockSpec((ns, hidden), lambda i: (0, 0)),      # src feats (resident)
            pl.BlockSpec((tnd, hidden), lambda i: (i, 0)),     # dst feats tile
            pl.BlockSpec((hidden, heads), lambda i: (0, 0)),   # lin_src pack
            pl.BlockSpec((hidden, heads), lambda i: (0, 0)),   # lin_dst pack
            pl.BlockSpec((tnd, ns), lambda i: (i, 0)),         # int8 adjacency tile
        ],
        out_specs=pl.BlockSpec((tnd, hidden), lambda i: (i, 0)),
        compiler_params=pltpu.CompilerParams(
            dimension_semantics=("parallel",),
            vmem_limit_bytes=48 * 1024 * 1024,                 # safe on v5e/v6e/v7x
        ),
    )(xs, xd, a_src_pack, a_dst_pack, adj)
    return out[:nd]


# ---------------------------------------------------------------------------
# Kernel 3: semantic (relation-level) attention + fused classifier head.
#           Relations stream over an "arbitrary" grid axis (online softmax).
# ---------------------------------------------------------------------------
def _semantic_kernel(outs_ref, wk_ref, bk_ref, q_ref, wl_ref, bl_ref, o_ref,
                     acc_ref, m_ref, l_ref):
    r = pl.program_id(0)
    nr = pl.num_programs(0)

    out_r = outs_ref[...]                                    # [N, F] f32

    # relation score: q . mean_n tanh(out_r @ Wk + bk)
    k = jnp.tanh(
        jnp.dot(out_r, wk_ref[...], preferred_element_type=jnp.float32)
        + bk_ref[...])
    score = jnp.sum(q_ref[...] * jnp.mean(k, axis=0, keepdims=True))

    @pl.when(r == 0)
    def _():
        m_ref[0] = jnp.float32(-1e30)
        l_ref[0] = jnp.float32(0.0)
        acc_ref[...] = jnp.zeros_like(acc_ref)
        o_ref[...] = jnp.zeros_like(o_ref)

    # online softmax over relations
    m_old = m_ref[0]
    m_new = jnp.maximum(m_old, score)
    a = jnp.exp(m_old - m_new)
    e = jnp.exp(score - m_new)
    acc_ref[...] = acc_ref[...] * a + out_r * e
    l_ref[0] = l_ref[0] * a + e
    m_ref[0] = m_new

    @pl.when(r == nr - 1)
    def _():
        sem = acc_ref[...] * (1.0 / l_ref[0])
        o_ref[...] = (
            jnp.dot(sem, wl_ref[...], preferred_element_type=jnp.float32)
            + bl_ref[...])


def pallas_semantic_classify(rel_outs, wk, bk, q, wl, bl):
    r, n, f = rel_outs.shape
    c = wl.shape[1]
    return pl.pallas_call(
        _semantic_kernel,
        out_shape=jax.ShapeDtypeStruct((n, c), jnp.float32),
        grid=(r,),
        in_specs=[
            pl.BlockSpec((None, n, f), lambda i: (i, 0, 0)),   # one relation per step
            pl.BlockSpec((f, f), lambda i: (0, 0)),            # k_lin weight
            pl.BlockSpec((1, f), lambda i: (0, 0)),            # k_lin bias
            pl.BlockSpec((1, f), lambda i: (0, 0)),            # q
            pl.BlockSpec((f, c), lambda i: (0, 0)),            # classifier weight
            pl.BlockSpec((1, c), lambda i: (0, 0)),            # classifier bias
        ],
        out_specs=pl.BlockSpec((n, c), lambda i: (0, 0)),
        scratch_shapes=[
            pltpu.VMEM((n, f), jnp.float32),                   # running weighted sum
            pltpu.SMEM((1,), jnp.float32),                     # running max
            pltpu.SMEM((1,), jnp.float32),                     # running denom
        ],
        compiler_params=pltpu.CompilerParams(
            dimension_semantics=("arbitrary",)),
    )(rel_outs, wk, bk.reshape(1, f), q.reshape(1, f), wl, bl.reshape(1, c))


# ---------------------------------------------------------------------------
# Glue: full HAN forward
# ---------------------------------------------------------------------------
def pack_block_diag(w_hd):
    # [H, D] per-head attention vectors -> [H*D, H] block-diagonal matrix so
    # that (x @ pack)[n, h] == sum_d x[n, h*D + d] * w_hd[h, d]
    h, d = w_hd.shape
    eye = jnp.eye(h, dtype=w_hd.dtype)
    return (w_hd[:, :, None] * eye[:, None, :]).reshape(h * d, h)


def edge_index_to_adj(edge_index, n_src, n_dst):
    # NOTE: parallel (duplicate) edges are deduplicated; inputs are unique edges.
    src, dst = edge_index[0], edge_index[1]
    return jnp.zeros((n_dst, n_src), jnp.int8).at[dst, src].set(jnp.int8(1))


def han_forward(x_dict, edge_index_dict, params, metadata, target, heads):
    node_types, edge_types = metadata

    # 1) per-node-type projection -> lane-dense [N, hidden] f32
    h_node = {
        nt: pallas_linear(x_dict[nt], *params["proj"][nt], out_dtype=jnp.float32)
        for nt in node_types
    }

    # 2) per-edge-type node-level attention (softmax over incoming edges, relu)
    out_lists = {nt: [] for nt in node_types}
    for et in edge_types:
        src_t, _, dst_t = et
        key = "__".join(et)
        adj = edge_index_to_adj(
            edge_index_dict[et],
            n_src=h_node[src_t].shape[0],
            n_dst=h_node[dst_t].shape[0],
        )
        a_src_pack = pack_block_diag(params["lin_src"][key]).astype(jnp.float32)
        a_dst_pack = pack_block_diag(params["lin_dst"][key]).astype(jnp.float32)
        out = pallas_han_edge(
            h_node[src_t], h_node[dst_t], a_src_pack, a_dst_pack, adj, heads
        )                                                     # [Nd, hidden] f32
        out_lists[dst_t].append(out)

    # 3) semantic attention over relations into the target type + classifier
    rel_outs = jnp.stack(out_lists[target], axis=0)           # [R, N, hidden]
    wk, bk = params["k_lin"]
    wl, bl = params["lin"]
    return pallas_semantic_classify(rel_outs, wk, bk, params["q"], wl, bl)


# ---------------------------------------------------------------------------
# main
# ---------------------------------------------------------------------------
def make_edge_index(key, n_src, n_dst, n_edges):
    # unique edges (sampled without replacement), PyG convention: [src; dst]
    idx = jax.random.choice(key, n_src * n_dst, shape=(n_edges,), replace=False)
    src = (idx % n_src).astype(jnp.int32)
    dst = (idx // n_src).astype(jnp.int32)
    return jnp.stack([src, dst], axis=0)


if __name__ == "__main__":
    heads, hidden, out_channels = 4, 32, 5
    node_types = ["paper", "author"]
    edge_types = [
        ("author", "writes", "paper"),
        ("paper", "cites", "paper"),
        ("paper", "rev_writes", "author"),
    ]
    n_nodes = {"paper": 16, "author": 12}
    in_ch = {"paper": 8, "author": 6}
    n_edges = {edge_types[0]: 30, edge_types[1]: 40, edge_types[2]: 25}
    target = "paper"

    keys = iter(jax.random.split(jax.random.PRNGKey(0), 32))

    x_dict = {
        nt: jax.random.normal(next(keys), (n_nodes[nt], in_ch[nt]), jnp.float32)
        for nt in node_types
    }
    edge_index_dict = {
        et: make_edge_index(next(keys), n_nodes[et[0]], n_nodes[et[2]], n_edges[et])
        for et in edge_types
    }

    D = hidden // heads
    params = {
        "proj": {
            nt: (
                0.1 * jax.random.normal(next(keys), (in_ch[nt], hidden), jnp.float32),
                0.01 * jax.random.normal(next(keys), (hidden,), jnp.float32),
            )
            for nt in node_types
        },
        "lin_src": {
            "__".join(et): 0.1 * jax.random.normal(next(keys), (heads, D), jnp.float32)
            for et in edge_types
        },
        "lin_dst": {
            "__".join(et): 0.1 * jax.random.normal(next(keys), (heads, D), jnp.float32)
            for et in edge_types
        },
        "k_lin": (
            0.1 * jax.random.normal(next(keys), (hidden, hidden), jnp.float32),
            0.01 * jax.random.normal(next(keys), (hidden,), jnp.float32),
        ),
        "q": 0.1 * jax.random.normal(next(keys), (hidden,), jnp.float32),
        "lin": (
            0.1 * jax.random.normal(next(keys), (hidden, out_channels), jnp.float32),
            0.01 * jax.random.normal(next(keys), (out_channels,), jnp.float32),
        ),
    }

    out = han_forward(
        x_dict, edge_index_dict, params,
        metadata=(node_types, edge_types), target=target, heads=heads,
    )
    out = jax.block_until_ready(out)
    assert out.shape == (n_nodes[target], out_channels)
    assert bool(jnp.all(jnp.isfinite(out)))
    print("KERNEL_OK")
</pallas_src>

<mosaic_0001>
module attributes {stable_mosaic.version = 11 : i64} {
  func.func @_linear_kernel(%arg0: i32, %arg1: memref<32x8xf32, #tpu.memory_space<vmem>>, %arg2: memref<8x32xf32, #tpu.memory_space<vmem>>, %arg3: memref<1x32xf32, #tpu.memory_space<vmem>>, %arg4: memref<32x32xf32, #tpu.memory_space<vmem>>) attributes {dimension_semantics = [#tpu.dimension_semantics<parallel>], iteration_bounds = array<i64: 1>, scalar_prefetch = 0 : i64, scratch_operands = 0 : i64, tpu.core_type = #tpu.core_type<tc>, window_params = [{transform_indices = @transform_0, window_bounds = array<i64: 32, 8>}, {pipeline_mode = #tpu.pipeline_mode<synchronous>, transform_indices = @transform_1, window_bounds = array<i64: 8, 32>}, {pipeline_mode = #tpu.pipeline_mode<synchronous>, transform_indices = @transform_2, window_bounds = array<i64: 1, 32>}, {transform_indices = @transform_3, window_bounds = array<i64: 32, 32>}]} {
    %c0 = arith.constant 0 : index
    %c0_0 = arith.constant 0 : index
    %0 = vector.load %arg1[%c0, %c0_0] : memref<32x8xf32, #tpu.memory_space<vmem>>, vector<32x8xf32>
    %c0_1 = arith.constant 0 : index
    %c0_2 = arith.constant 0 : index
    %1 = vector.load %arg2[%c0_1, %c0_2] : memref<8x32xf32, #tpu.memory_space<vmem>>, vector<8x32xf32>
    %cst = arith.constant dense<0.000000e+00> : vector<32x32xf32>
    %2 = tpu.matmul %0, %1, %cst {dimension_numbers = #tpu.dot_dimension_numbers<[1], [0], [0], [1], [0, 0, 1, 1], [], []>} : vector<32x8xf32>, vector<8x32xf32>, vector<32x32xf32> -> vector<32x32xf32>
    %c0_3 = arith.constant 0 : index
    %c0_4 = arith.constant 0 : index
    %3 = vector.load %arg3[%c0_3, %c0_4] : memref<1x32xf32, #tpu.memory_space<vmem>>, vector<1x32xf32>
    %4 = vector.broadcast %3 : vector<1x32xf32> to vector<32x32xf32>
    %5 = arith.addf %2, %4 : vector<32x32xf32>
    %c0_5 = arith.constant 0 : index
    %c0_6 = arith.constant 0 : index
    %6 = vector.load %arg4[%c0_5, %c0_6] : memref<32x32xf32, #tpu.memory_space<vmem>>, vector<32x32xf32>
    tpu.vector_store %arg4[%c0_5, %c0_6], %5 {strides = array<i32>} : memref<32x32xf32, #tpu.memory_space<vmem>>, vector<32x32xf32>,
    return
  }
  func.func @transform_0(%arg0: i32) -> (i32, i32) {
    %c0_i32 = arith.constant 0 : i32
    %c0_i32_0 = arith.constant 0 : i32
    return %arg0, %c0_i32 : i32, i32
  }
  func.func @transform_1(%arg0: i32) -> (i32, i32) {
    %c0_i32 = arith.constant 0 : i32
    %c0_i32_0 = arith.constant 0 : i32
    %c0_i32_1 = arith.constant 0 : i32
    return %c0_i32, %c0_i32_0 : i32, i32
  }
  func.func @transform_2(%arg0: i32) -> (i32, i32) {
    %c0_i32 = arith.constant 0 : i32
    %c0_i32_0 = arith.constant 0 : i32
    %c0_i32_1 = arith.constant 0 : i32
    return %c0_i32, %c0_i32_0 : i32, i32
  }
  func.func @transform_3(%arg0: i32) -> (i32, i32) {
    %c0_i32 = arith.constant 0 : i32
    %c0_i32_0 = arith.constant 0 : i32
    return %arg0, %c0_i32 : i32, i32
  }
}

</mosaic_0001>

<bundles_post_ra>
// kernel: tpu_custom_call.1
= control target key start
LH: loop header
LB: loop body
LE: loop exit
PB: predicated region body
PF: predicated region fallthrough
CT: control target
= control target key end

     0   :  { %vm27_vm0 = vcmask 64512   ;;  %s235_s0 = inlined_call_operand.vmem [shape: f32[32,8], index: 0, kind: input, shape index: {}]   ;;  %s236_s1 = inlined_call_operand.vmem [shape: f32[8,32], index: 1, kind: input, shape index: {}]   ;;  %s237_s2 = inlined_call_operand.vmem [shape: f32[1,32], index: 2, kind: input, shape index: {}]   ;;  %s238_s3 = inlined_call_operand.hbm [shape: f32[32,32], index: 3, kind: output, shape index: {}]  }
   0x1   :  { %v19_v0 = vld [vmem:[%s236_s1] sm:$0xff]  ;;  %v17_v2 = vld [vmem:[%s235_s0 + $0x10] sm:$0xff]  ;;  %v16_v3 = vld [vmem:[%s235_s0 + $0x8] sm:$0xff] }
   0x2   :  { %v15_v1 = vld [vmem:[%s235_s0] sm:$0xff]  ;;  %156 = vmatprep.subr.mxu0 %v19_v0  ;;  %164 = vmatprep.subr.mxu1 %v19_v0  ;;  %v18_v4 = vld [vmem:[%s235_s0 + $0x18] sm:$0xff] }
   0x3   :  { %8 = vsyncpa [#allocation3], 0  ;;  %157 = vmatpush3.msra.mxu0 %v19_v0  ;;  %165 = vmatpush3.msra.mxu1 %v19_v0  ;;  %v146_v5 = vld [vmem:[%s237_s2] ss:$0 sm:$0xff]  ;;  %s191_s23 = smov [#allocation2]   ;;  %vm125_vm1 = vcmask 261120  }
   0x4   :  { %158 = vmatprep.mubr.msk.f32.mxu0 %vm27_vm0, %v15_v1  ;;  %161 = vmatprep.mubr.msk.f32.mxu1 %vm27_vm0, %v17_v2  ;;  %s135_s24 = sshll.u32 %s191_s23, 4  ;;  %s136_s24 = int_to_ptr.vmem [resolvable:$true] %s135_s24 }
   0x5   :  { %159 = vmatmul.mubr.msk.f32.vlgmr.msra.gmra.mxu0 %vm27_vm0, %v16_v3  ;;  %162 = vmatmul.mubr.msk.f32.vlgmr.msra.gmra.mxu1 %vm27_vm0, %v18_v4  ;;  %s169_s0 = scalar_lea.vmem %s136_s24, 512  ;;  %p174_p1 = scmp.lt.s32.totalorder %s136_s24, %s136_s24 }
   0x6   :  { %p170_p0 = scmp.ne.s32.totalorder %s136_s24, %s169_s0  ;;  %p175_p2 = scmp.lt.s32.totalorder %s169_s0, %s169_s0 }
   0x8   :  { %p176_p3 = por %p175_p2, %p174_p1 }
   0xa   :  { %p177_p4 = pnand %p176_p3, %p170_p0 }
  0xc5   :  { %v160_v6 = vpop.f32.mrf.mxu0  ;;  %v163_v7 = vpop.f32.mrf.mxu1 }
  0xc6   :  { %v112_v8 = vadd.f32 %v160_v6, %v146_v5  ;;  %v122_v9 = vadd.f32 %v163_v7, %v146_v5 }
  0xc7   :  { %v106_v10 = vpop.f32.mrf.mxu0  ;;  %v116_v11 = vpop.f32.mrf.mxu1 }
  0xc8   :  { %127 = vst.msk [vmem:[#allocation2 + $0x8] sm:$0xff] %vm125_vm1, %v112_v8  ;;  %129 = vst.msk [vmem:[#allocation2 + $0x18] sm:$0xff] %vm125_vm1, %v122_v9  ;;  %v107_v12 = vadd.f32 %v146_v5, %v106_v10  ;;  %v117_v13 = vadd.f32 %v146_v5, %v116_v11 }
  0xca   :  { %126 = vst.msk [vmem:[#allocation2] sm:$0xff] %vm125_vm1, %v107_v12  ;;  %128 = vst.msk [vmem:[#allocation2 + $0x10] sm:$0xff] %vm125_vm1, %v117_v13 }
  0xcb   :  { %180 = shalt.err (!%p177_p4)
}
  0xcc   :  { %s192_s2 = smov 128   ;;  %s193_s25 = smov 8  }
  0xcd   :  { %141 = dma.vmem_to_hbm [thread:$0]  %s136_s24, 512, %s238_s3, [#allocation3], %s192_s2, %s192_s2, %s193_s25  }
  0xce   :  { %189 = dma.done.wait [#allocation3], 512  }
  0xcf   :  { %190 = vsyncadd [#allocation3], 4294966784 }
  0xd0   :  { %145 = vsyncpa [#allocation3], 1 }

</bundles_post_ra>
